<compile_context>
chip_gen: v7x
topology: tpu7x:2x2x1
jax: 0.10.0
libtpu: 0.0.40
codegen_flags: <defaults>
</compile_context>

<pallas_src>
import functools

import jax
import jax.numpy as jnp
from jax import lax
from jax.experimental import pallas as pl
from jax.experimental.pallas import tpu as pltpu


def _round_up(x, m):
    return (x + m - 1) // m * m


def _tile_plan(tm, m):
    """Token-tile size, padded length, #tiles and in-kernel chunk size."""
    tm = max(128, _round_up(int(tm), 128))
    tm = min(tm, _round_up(m, 128))
    m_pad = _round_up(m, tm)
    nt = m_pad // tm
    cs = 128
    for cand in (512, 256, 128):          # largest chunk that divides the tile
        if tm % cand == 0:
            cs = cand
            break
    return tm, m_pad, nt, cs


# ----------------------------------------------------------------------------
# Forward kernels (per-mode specializations).
# Tokens are (C, TM) on the lane axis; tiny weights stay VMEM-resident.
# The whole encoder->VQ->decode->loss pipeline runs per 128..512-lane chunk so
# no (K, TM)-sized intermediate is ever live (kills vreg spills).
# ----------------------------------------------------------------------------
def _vae_fwd_kernel(total_m, cs, x_ref, ewt_ref, cb_ref, cbsq_ref, deccb_ref,
                    part_ref, idx_ref):
    i = pl.program_id(0)
    tm = x_ref.shape[1]
    k = cb_ref.shape[0]
    lane = lax.broadcasted_iota(jnp.int32, (8, 128), 1)
    part_ref[...] = jnp.zeros_like(part_ref)

    @pl.loop(0, tm // cs)
    def _(ci):
        off = pl.multiple_of(ci * cs, cs)
        x_c = x_ref[:, pl.ds(off, cs)].astype(jnp.float32)                  # (C, CS)
        # encoder 1x1 conv
        z = jnp.dot(ewt_ref[...], x_c, preferred_element_type=jnp.float32)  # (D, CS)
        # VQ: dist = ||z||^2 - 2 z.cb + ||cb||^2 ; argmin over K drops ||z||^2
        cross = jnp.dot(cb_ref[...], z, preferred_element_type=jnp.float32)  # (K, CS)
        dpart = cbsq_ref[...] - 2.0 * cross                                  # (K, CS)
        min_dpart = jnp.min(dpart, axis=0, keepdims=True)                    # (1, CS)
        krow = lax.broadcasted_iota(jnp.int32, (k, cs), 0).astype(jnp.float32)
        cand = jnp.where(dpart <= min_dpart, krow, float(k))
        first = jnp.min(cand, axis=0, keepdims=True)                         # (1, CS)
        onehot = (krow == first).astype(jnp.float32)                         # (K, CS)
        # decoder folded into the codebook: recon = (cb @ dec_w).T @ onehot
        recon = jnp.dot(deccb_ref[...], onehot,
                        preferred_element_type=jnp.float32)                  # (C, CS)

        idx_ref[:, pl.ds(off, cs)] = first.astype(jnp.int32)

        # masked per-chunk loss partial sums
        col = lax.broadcasted_iota(jnp.int32, (1, cs), 1) + (i * tm + off)
        valid = (col < total_m).astype(jnp.float32)
        z_sq = jnp.sum(z * z, axis=0, keepdims=True)
        commit = jnp.maximum(min_dpart + z_sq, 0.0)        # == ||z - zq||^2
        rsq = jnp.sum((recon - x_c) ** 2, axis=0, keepdims=True)
        rsum = jnp.sum(valid * rsq, axis=1, keepdims=True)
        csum = jnp.sum(valid * commit, axis=1, keepdims=True)
        part_ref[...] += (jnp.where(lane == 0, rsum, 0.0)
                          + jnp.where(lane == 1, csum, 0.0))


def _discr_fwd_kernel(total_m, cs, x_ref, ewt_ref, cb_ref, cbsq_ref, deccb_ref,
                      dw_ref, part_ref, ind_ref):
    i = pl.program_id(0)
    tm = x_ref.shape[1]
    c = x_ref.shape[0]
    k = cb_ref.shape[0]
    lane = lax.broadcasted_iota(jnp.int32, (8, 128), 1)
    part_ref[...] = jnp.zeros_like(part_ref)

    @pl.loop(0, tm // cs)
    def _(ci):
        off = pl.multiple_of(ci * cs, cs)
        x_c = x_ref[:, pl.ds(off, cs)].astype(jnp.float32)                  # (C, CS)
        z = jnp.dot(ewt_ref[...], x_c, preferred_element_type=jnp.float32)
        cross = jnp.dot(cb_ref[...], z, preferred_element_type=jnp.float32)
        dpart = cbsq_ref[...] - 2.0 * cross
        min_dpart = jnp.min(dpart, axis=0, keepdims=True)
        krow = lax.broadcasted_iota(jnp.int32, (k, cs), 0).astype(jnp.float32)
        cand = jnp.where(dpart <= min_dpart, krow, float(k))
        first = jnp.min(cand, axis=0, keepdims=True)
        onehot = (krow == first).astype(jnp.float32)
        recon = jnp.dot(deccb_ref[...], onehot,
                        preferred_element_type=jnp.float32)                  # fake (C, CS)

        col = lax.broadcasted_iota(jnp.int32, (1, cs), 1) + (i * tm + off)
        valid = (col < total_m).astype(jnp.float32)
        dw = dw_ref[...]                                                     # (C, 1)
        # 1-lane discriminator contraction on the VPU
        d_real = jnp.sum(dw * x_c, axis=0, keepdims=True)                    # (1, CS)
        d_fake = jnp.sum(dw * recon, axis=0, keepdims=True)                  # (1, CS)
        ind_real = jnp.where(1.0 - d_real > 0.0, 1.0, 0.0) * valid
        ind_fake = jnp.where(1.0 + d_fake > 0.0, 1.0, 0.0) * valid
        hinge = (jnp.maximum(0.0, 1.0 - d_real)
                 + jnp.maximum(0.0, 1.0 + d_fake)) * valid
        hsum = jnp.sum(hinge, axis=1, keepdims=True)                         # (1, 1)
        s_real = jnp.sum(x_c * ind_real, axis=1, keepdims=True)              # (C, 1)
        s_fake = jnp.sum(recon * ind_fake, axis=1, keepdims=True)            # (C, 1)

        ind_ref[:, pl.ds(off, cs)] = ind_real                                # residual

        s_real8 = jnp.pad(s_real, ((0, 8 - c), (0, 0)))                      # (8, 1)
        s_fake8 = jnp.pad(s_fake, ((0, 8 - c), (0, 0)))
        part_ref[...] += (jnp.where(lane == 0, hsum, 0.0)
                          + jnp.where(lane == 1, s_real8, 0.0)
                          + jnp.where(lane == 2, s_fake8, 0.0))


# ----------------------------------------------------------------------------
# Fused VAE backward kernel: recomputes z / zq / recon from (x, idx), streams
# g_x, and accumulates g_enc_w / g_dec_w as per-tile partials.
# ----------------------------------------------------------------------------
def _vae_bwd_kernel(total_m, cs, coef_ref, x_ref, idx_ref, ewt_ref, cbt_ref,
                    dwt_ref, dec_ref, enc_ref, gx_ref, wpart_ref,
                    gdw_sc, gew_sc):
    i = pl.program_id(0)
    tm = x_ref.shape[1]
    d, c = ewt_ref.shape
    k = cbt_ref.shape[1]
    rows8 = wpart_ref.shape[0]

    gdw_sc[...] = jnp.zeros_like(gdw_sc)
    gew_sc[...] = jnp.zeros_like(gew_sc)
    c1 = coef_ref[0:1, 0:1]        # 2 g / (m * C)
    c2 = coef_ref[0:1, 1:2]        # 2 g / (m * D)

    @pl.loop(0, tm // cs)
    def _(ci):
        off = pl.multiple_of(ci * cs, cs)
        x_c = x_ref[:, pl.ds(off, cs)].astype(jnp.float32)                   # (C, CS)
        idx_c = idx_ref[:, pl.ds(off, cs)]                                   # (1, CS) i32
        krow = lax.broadcasted_iota(jnp.int32, (k, cs), 0)
        onehot = (krow == idx_c).astype(jnp.float32)                         # (K, CS)

        z = jnp.dot(ewt_ref[...], x_c, preferred_element_type=jnp.float32)   # (D, CS)
        zq = jnp.dot(cbt_ref[...], onehot, preferred_element_type=jnp.float32)
        recon = jnp.dot(dwt_ref[...], zq, preferred_element_type=jnp.float32)

        col = lax.broadcasted_iota(jnp.int32, (1, cs), 1) + (i * tm + off)
        valid = (col < total_m).astype(jnp.float32)

        g_recon = c1 * (recon - x_c) * valid                                 # (C, CS)
        g_z = (jnp.dot(dec_ref[...], g_recon, preferred_element_type=jnp.float32)
               + c2 * (z - zq) * valid)                                      # (D, CS)
        g_x = (jnp.dot(enc_ref[...], g_z, preferred_element_type=jnp.float32)
               - g_recon)                                                    # (C, CS)
        gx_ref[:, pl.ds(off, cs)] = g_x

        # weight-grad partials: contract over the (lane) token axis
        gdw_sc[...] += jnp.einsum('dm,cm->dc', zq, g_recon,
                                  preferred_element_type=jnp.float32)        # (D, C)
        gew_sc[...] += jnp.einsum('cm,dm->cd', x_c, g_z,
                                  preferred_element_type=jnp.float32)        # (C, D)

    gdw_p = jnp.pad(gdw_sc[...], ((0, rows8 - d), (0, 0)))                   # (rows8, C)
    gew_p = jnp.pad(gew_sc[...], ((0, rows8 - c), (0, 0)))                   # (rows8, D)
    wpart_ref[...] = jnp.concatenate([gdw_p, gew_p], axis=1)                 # (rows8, C+D)


# ----------------------------------------------------------------------------
# pallas_call wrappers
# ----------------------------------------------------------------------------
def _vqgan_forward(params, x_t, mode, tm):
    """x_t: (C, M) f32 channels-major tokens.  Returns (loss, (x_bf, x_pad, res))."""
    c, m = x_t.shape
    d = params["enc_w"].shape[1]
    k = params["codebook"].shape[0]
    tm_eff, m_pad, nt, cs = _tile_plan(tm, m)

    x_bf = x_t.astype(jnp.bfloat16)                       # bf16 I/O, f32 accumulation
    x_pad = x_bf if m_pad == m else jnp.pad(x_bf, ((0, 0), (0, m_pad - m)))

    ewt = params["enc_w"].T                               # (D, C)
    cb = params["codebook"]                               # (K, D)
    cbsq = jnp.sum(cb * cb, axis=1, keepdims=True)        # (K, 1)
    deccb = (cb @ params["dec_w"]).T                      # (C, K)  decoder folded in

    part_shape = jax.ShapeDtypeStruct((nt * 8, 128), jnp.float32)
    part_spec = pl.BlockSpec((8, 128), lambda i: (i, 0))

    def tok_spec(rows):
        return pl.BlockSpec((rows, tm_eff), lambda i: (0, i))

    def w_spec(shape):
        return pl.BlockSpec(shape, lambda i: (0, 0))

    common_in = [tok_spec(c), w_spec((d, c)), w_spec((k, d)),
                 w_spec((k, 1)), w_spec((c, k))]

    if mode == "vae":
        kern = functools.partial(_vae_fwd_kernel, m, cs)
        out_shape = (part_shape, jax.ShapeDtypeStruct((1, m_pad), jnp.int32))
        in_specs = common_in
        args = (x_pad, ewt, cb, cbsq, deccb)
    else:
        kern = functools.partial(_discr_fwd_kernel, m, cs)
        out_shape = (part_shape, jax.ShapeDtypeStruct((1, m_pad), jnp.float32))
        in_specs = common_in + [w_spec((c, 1))]
        args = (x_pad, ewt, cb, cbsq, deccb, params["disc_w"])

    outs = pl.pallas_call(
        kern,
        out_shape=out_shape,
        grid=(nt,),
        in_specs=in_specs,
        out_specs=(part_spec, tok_spec(1)),
        compiler_params=pltpu.CompilerParams(
            dimension_semantics=("parallel",),          # shard tiles across TCs (v7x)
            vmem_limit_bytes=32 * 1024 * 1024),
    )(*args)

    p = outs[0].reshape(nt, 8, 128).sum(axis=0)           # reduce per-tile partials
    if mode == "vae":
        loss = p[0, 0] / (m * c) + p[0, 1] / (m * d)
        res = (outs[1],)                                  # code indices
    else:
        loss = p[0, 0] / m
        res = (outs[1], p[:c, 1], p[:c, 2])               # indicator, S_real, S_fake
    return loss, (x_bf, x_pad, res)


def _vae_backward(params, x_pad, idx, g, m_true, tm):
    c, m_pad = x_pad.shape
    d = params["enc_w"].shape[1]
    k = params["codebook"].shape[0]
    tm_eff, _, nt, cs = _tile_plan(tm, m_true)
    rows8 = _round_up(max(c, d), 8)
    wp_w = c + d

    coef = jnp.stack([2.0 * g / (m_true * c),
                      2.0 * g / (m_true * d)]).reshape(1, 2).astype(jnp.float32)

    gx_pad, wparts = pl.pallas_call(
        functools.partial(_vae_bwd_kernel, m_true, cs),
        out_shape=(jax.ShapeDtypeStruct((c, m_pad), jnp.float32),
                   jax.ShapeDtypeStruct((nt * rows8, wp_w), jnp.float32)),
        grid=(nt,),
        in_specs=[pl.BlockSpec((1, 2), lambda i: (0, 0)),        # scale coefficients
                  pl.BlockSpec((c, tm_eff), lambda i: (0, i)),   # x (bf16)
                  pl.BlockSpec((1, tm_eff), lambda i: (0, i)),   # code idx
                  pl.BlockSpec((d, c), lambda i: (0, 0)),        # enc_w.T
                  pl.BlockSpec((d, k), lambda i: (0, 0)),        # codebook.T
                  pl.BlockSpec((c, d), lambda i: (0, 0)),        # dec_w.T
                  pl.BlockSpec((d, c), lambda i: (0, 0)),        # dec_w
                  pl.BlockSpec((c, d), lambda i: (0, 0))],       # enc_w
        out_specs=(pl.BlockSpec((c, tm_eff), lambda i: (0, i)),
                   pl.BlockSpec((rows8, wp_w), lambda i: (i, 0))),
        scratch_shapes=[pltpu.VMEM((d, c), jnp.float32),
                        pltpu.VMEM((c, d), jnp.float32)],
        compiler_params=pltpu.CompilerParams(
            dimension_semantics=("parallel",),
            vmem_limit_bytes=32 * 1024 * 1024),
    )(coef, x_pad, idx, params["enc_w"].T, params["codebook"].T,
      params["dec_w"].T, params["dec_w"], params["enc_w"])

    wp = wparts.reshape(nt, rows8, wp_w).sum(axis=0)
    g_dec_w = wp[:d, :c]
    g_enc_w = wp[:c, c:c + d]
    return gx_pad[:, :m_true], g_enc_w, g_dec_w


# ----------------------------------------------------------------------------
# custom_vjp: Pallas forward + (vae) fused Pallas backward / (discr) tiny XLA
# backward from the kernel's residuals -- no duplicate forward anywhere.
# ----------------------------------------------------------------------------
@functools.partial(jax.custom_vjp, nondiff_argnums=(0, 1))
def vqgan_loss(mode, tm, params, x_t):
    loss, _ = _vqgan_forward(params, x_t, mode, tm)
    return loss


def _vqgan_loss_fwd(mode, tm, params, x_t):
    loss, (x_bf, x_pad, res) = _vqgan_forward(params, x_t, mode, tm)
    return loss, (params, x_bf, x_pad, res)


def _vqgan_loss_bwd(mode, tm, saved, g):
    params, x_bf, x_pad, res = saved
    c, m = x_bf.shape

    if mode == "vae":
        (idx,) = res
        g_x, g_enc_w, g_dec_w = _vae_backward(params, x_pad, idx, g, m, tm)
        grads = {
            "enc_w": g_enc_w,
            "codebook": jnp.zeros_like(params["codebook"]),
            "dec_w": g_dec_w,
            "disc_w": jnp.zeros_like(params["disc_w"]),
        }
    else:
        ind, s_real, s_fake = res
        gm = g / m
        g_disc_w = (gm * (s_fake - s_real)).reshape(c, 1)
        g_x = (-gm) * params["disc_w"] * ind[:, :m]          # (C,1)*(1,M) outer product
        grads = {
            "enc_w": jnp.zeros_like(params["enc_w"]),
            "codebook": jnp.zeros_like(params["codebook"]),
            "dec_w": jnp.zeros_like(params["dec_w"]),
            "disc_w": g_disc_w,
        }
    return grads, g_x.astype(jnp.float32)


vqgan_loss.defvjp(_vqgan_loss_fwd, _vqgan_loss_bwd)


# ----------------------------------------------------------------------------
# Pure-JAX references (parity checks only)
# ----------------------------------------------------------------------------
def _vae_loss_ref(params, x_t):
    x = x_t.T
    z = x @ params["enc_w"]
    cb = params["codebook"]
    dist = (jnp.sum(z * z, -1, keepdims=True) - 2.0 * (z @ cb.T)
            + jnp.sum(cb * cb, -1)[None, :])
    zq = cb[jnp.argmin(dist, axis=-1)]
    zq_st = z + lax.stop_gradient(zq - z)                  # straight-through
    commit = jnp.mean((z - lax.stop_gradient(zq)) ** 2)
    recon = zq_st @ params["dec_w"]
    return jnp.mean((recon - x) ** 2) + commit


def _discr_loss_ref(params, x_t):
    x = x_t.T
    z = x @ params["enc_w"]
    cb = params["codebook"]
    dist = (jnp.sum(z * z, -1, keepdims=True) - 2.0 * (z @ cb.T)
            + jnp.sum(cb * cb, -1)[None, :])
    zq = cb[jnp.argmin(dist, axis=-1)]
    fake = lax.stop_gradient(zq @ params["dec_w"])         # generator detached
    d_real = x @ params["disc_w"]
    d_fake = fake @ params["disc_w"]
    return (jnp.mean(jnp.maximum(0.0, 1.0 - d_real))
            + jnp.mean(jnp.maximum(0.0, 1.0 + d_fake)))


# ----------------------------------------------------------------------------
# Trainer (equivalent of VQGanVAETrainer.forward)
# ----------------------------------------------------------------------------
class VQGanVAETrainer:
    # tm: token-tile size for the Pallas grid.  8192 amortizes the ~0.35us
    # per-grid-step cost on v5e/v6e; use ~32768 on v7x (higher HBM BW, 2 TCs).
    def __init__(self, params, lr=3e-4, b1=0.9, b2=0.999, eps=1e-8, tm=8192):
        self.params = params
        self.lr, self.b1, self.b2, self.eps = lr, b1, b2, eps
        self.tm = tm
        zeros = lambda p: jnp.zeros_like(p)
        self.m = jax.tree_util.tree_map(zeros, params)
        self.v = jax.tree_util.tree_map(zeros, params)
        self.t = 0
        self.state = True            # register_buffer('state', ones(bool))

    def _adam_step(self, grads):
        self.t += 1
        b1, b2, lr, eps, t = self.b1, self.b2, self.lr, self.eps, self.t
        self.m = jax.tree_util.tree_map(lambda m, g: b1 * m + (1 - b1) * g,
                                        self.m, grads)
        self.v = jax.tree_util.tree_map(lambda v, g: b2 * v + (1 - b2) * g * g,
                                        self.v, grads)

        def upd(p, m, v):
            mhat = m / (1.0 - b1 ** t)
            vhat = v / (1.0 - b2 ** t)
            return p - lr * mhat / (jnp.sqrt(vhat) + eps)

        self.params = jax.tree_util.tree_map(upd, self.params, self.m, self.v)

    def __call__(self, img):
        # img: (N, C, H, W) float32, NCHW like PyTorch; tokens go on the lane axis.
        n, c, h, w = img.shape
        x_t = jnp.transpose(img, (1, 0, 2, 3)).reshape(c, n * h * w)   # (C, M)

        mode = "vae" if self.state else "discr"
        loss_fn = functools.partial(vqgan_loss, mode, self.tm)
        loss, grads = jax.value_and_grad(loss_fn)(self.params, x_t)

        self._adam_step(grads)
        self.state = not self.state                    # state = ~state (copy_)
        return loss, bool(self.state)


def init_params(key, C=4, D=8, K=16):
    k1, k2, k3, k4 = jax.random.split(key, 4)
    return {
        "enc_w": 0.1 * jax.random.normal(k1, (C, D), jnp.float32),
        "codebook": 0.1 * jax.random.normal(k2, (K, D), jnp.float32),
        "dec_w": 0.1 * jax.random.normal(k3, (D, C), jnp.float32),
        "disc_w": 0.1 * jax.random.normal(k4, (C, 1), jnp.float32),
    }


if __name__ == "__main__":
    key = jax.random.PRNGKey(0)
    k_img, k_par = jax.random.split(key)

    img = jax.random.normal(k_img, (2, 4, 16, 16), jnp.float32)   # NCHW
    params = init_params(k_par, C=4, D=8, K=16)

    C = img.shape[1]
    x_t = jnp.transpose(img, (1, 0, 2, 3)).reshape(C, -1)          # (4, 512) tokens
    TM = 384     # 2 tiles of 384: exercises multi-tile grid, chunk loop, tail masking

    # Kernel I/O is bf16, so parity is checked against references fed the same
    # bf16-rounded tokens (accumulation inside the kernels stays f32).
    x_rounded = x_t.astype(jnp.bfloat16).astype(jnp.float32)

    # forward parity
    v_pl = vqgan_loss("vae", TM, params, x_t)
    d_pl = vqgan_loss("discr", TM, params, x_t)
    v_rf = _vae_loss_ref(params, x_rounded)
    d_rf = _discr_loss_ref(params, x_rounded)
    assert jnp.allclose(v_pl, v_rf, rtol=5e-3, atol=5e-3), (v_pl, v_rf)
    assert jnp.allclose(d_pl, d_rf, rtol=5e-3, atol=5e-3), (d_pl, d_rf)

    # gradient parity (fused Pallas bwd / analytic bwd vs jax.grad of references)
    g_pl_v = jax.grad(functools.partial(vqgan_loss, "vae", TM))(params, x_t)
    g_rf_v = jax.grad(_vae_loss_ref)(params, x_rounded)
    g_pl_d = jax.grad(functools.partial(vqgan_loss, "discr", TM))(params, x_t)
    g_rf_d = jax.grad(_discr_loss_ref)(params, x_rounded)
    for a, b in zip(jax.tree_util.tree_leaves(g_pl_v),
                    jax.tree_util.tree_leaves(g_rf_v)):
        assert jnp.allclose(a, b, rtol=5e-3, atol=5e-4), (a, b)
    for a, b in zip(jax.tree_util.tree_leaves(g_pl_d),
                    jax.tree_util.tree_leaves(g_rf_d)):
        assert jnp.allclose(a, b, rtol=5e-3, atol=5e-4), (a, b)

    # trainer: step 1 = state True -> VAE loss branch; step 2 -> discriminator branch
    trainer = VQGanVAETrainer(params, lr=3e-4, tm=TM)
    loss1, state1 = trainer(img)
    loss2, state2 = trainer(img)

    jax.block_until_ready((loss1, loss2))
    assert bool(jnp.isfinite(loss1)) and bool(jnp.isfinite(loss2))
    assert state1 is False and state2 is True
    print("KERNEL_OK")
</pallas_src>

<mosaic_0001>
module attributes {stable_mosaic.version = 11 : i64} {
  func.func @_vae_fwd_kernel(%arg0: i32, %arg1: memref<4x384xbf16, #tpu.memory_space<vmem>>, %arg2: memref<8x4xf32, #tpu.memory_space<vmem>>, %arg3: memref<16x8xf32, #tpu.memory_space<vmem>>, %arg4: memref<16x1xf32, #tpu.memory_space<vmem>>, %arg5: memref<4x16xf32, #tpu.memory_space<vmem>>, %arg6: memref<8x128xf32, #tpu.memory_space<vmem>>, %arg7: memref<1x384xi32, #tpu.memory_space<vmem>>) attributes {dimension_semantics = [#tpu.dimension_semantics<parallel>], iteration_bounds = array<i64: 2>, scalar_prefetch = 0 : i64, scratch_operands = 0 : i64, tpu.core_type = #tpu.core_type<tc>, window_params = [{transform_indices = @transform_0, window_bounds = array<i64: 4, 384>}, {pipeline_mode = #tpu.pipeline_mode<synchronous>, transform_indices = @transform_1, window_bounds = array<i64: 8, 4>}, {pipeline_mode = #tpu.pipeline_mode<synchronous>, transform_indices = @transform_2, window_bounds = array<i64: 16, 8>}, {pipeline_mode = #tpu.pipeline_mode<synchronous>, transform_indices = @transform_3, window_bounds = array<i64: 16, 1>}, {pipeline_mode = #tpu.pipeline_mode<synchronous>, transform_indices = @transform_4, window_bounds = array<i64: 4, 16>}, {transform_indices = @transform_5, window_bounds = array<i64: 8, 128>}, {transform_indices = @transform_6, window_bounds = array<i64: 1, 384>}]} {
    %0 = tpu.iota {dimensions = array<i32: 1>} : vector<8x128xi32>
    %cst = arith.constant 0.000000e+00 : f32
    %1 = vector.broadcast %cst : f32 to vector<8x128xf32>
    %c0 = arith.constant 0 : index
    %c0_0 = arith.constant 0 : index
    %2 = vector.load %arg6[%c0, %c0_0] : memref<8x128xf32, #tpu.memory_space<vmem>>, vector<8x128xf32>
    tpu.vector_store %arg6[%c0, %c0_0], %1 {strides = array<i32>} : memref<8x128xf32, #tpu.memory_space<vmem>>, vector<8x128xf32>,
    %c0_i32 = arith.constant 0 : i32
    %c3_i32 = arith.constant 3 : i32
    %3 = arith.addi %c0_i32, %c3_i32 : i32
    %c1_i32 = arith.constant 1 : i32
    scf.for %arg8 = %c0_i32 to %3 step %c1_i32  : i32 {
      %c1_i32_2 = arith.constant 1 : i32
      %4 = arith.muli %arg8, %c1_i32_2 : i32
      %c0_i32_3 = arith.constant 0 : i32
      %5 = arith.addi %c0_i32_3, %4 : i32
      %c128_i32 = arith.constant 128 : i32
      %6 = arith.muli %5, %c128_i32 : i32
      %7 = tpu.assume_multiple %6, 128 : i32
      %c0_4 = arith.constant 0 : index
      %8 = arith.index_cast %7 : i32 to index
      %9 = vector.load %arg1[%c0_4, %8] : memref<4x384xbf16, #tpu.memory_space<vmem>>, vector<4x128xbf16>
      %10 = arith.extf %9 : vector<4x128xbf16> to vector<4x128xf32>
      %c0_5 = arith.constant 0 : index
      %c0_6 = arith.constant 0 : index
      %11 = vector.load %arg2[%c0_5, %c0_6] : memref<8x4xf32, #tpu.memory_space<vmem>>, vector<8x4xf32>
      %cst_7 = arith.constant dense<0.000000e+00> : vector<8x128xf32>
      %12 = tpu.matmul %11, %10, %cst_7 {dimension_numbers = #tpu.dot_dimension_numbers<[1], [0], [0], [1], [0, 0, 1, 1], [], []>} : vector<8x4xf32>, vector<4x128xf32>, vector<8x128xf32> -> vector<8x128xf32>
      %c0_8 = arith.constant 0 : index
      %c0_9 = arith.constant 0 : index
      %13 = vector.load %arg3[%c0_8, %c0_9] : memref<16x8xf32, #tpu.memory_space<vmem>>, vector<16x8xf32>
      %cst_10 = arith.constant dense<0.000000e+00> : vector<16x128xf32>
      %14 = tpu.matmul %13, %12, %cst_10 {dimension_numbers = #tpu.dot_dimension_numbers<[1], [0], [0], [1], [0, 0, 1, 1], [], []>} : vector<16x8xf32>, vector<8x128xf32>, vector<16x128xf32> -> vector<16x128xf32>
      %c0_11 = arith.constant 0 : index
      %c0_12 = arith.constant 0 : index
      %15 = vector.load %arg4[%c0_11, %c0_12] : memref<16x1xf32, #tpu.memory_space<vmem>>, vector<16x1xf32>
      %cst_13 = arith.constant 2.000000e+00 : f32
      %16 = vector.broadcast %cst_13 : f32 to vector<16x128xf32>
      %17 = arith.mulf %16, %14 : vector<16x128xf32>
      %18 = vector.broadcast %15 : vector<16x1xf32> to vector<16x128xf32>
      %19 = arith.subf %18, %17 : vector<16x128xf32>
      %cst_14 = arith.constant dense<0x7F800000> : vector<128xf32>
      %20 = vector.multi_reduction <minimumf>, %19, %cst_14 [0] : vector<16x128xf32> to vector<128xf32>
      %21 = vector.shape_cast %20 : vector<128xf32> to vector<1x128xf32>
      %22 = tpu.iota {dimensions = array<i32: 0>} : vector<16x128xi32>
      %23 = arith.sitofp %22 : vector<16x128xi32> to vector<16x128xf32>
      %24 = vector.broadcast %21 : vector<1x128xf32> to vector<16x128xf32>
      %25 = arith.cmpf ole, %19, %24 : vector<16x128xf32>
      %cst_15 = arith.constant 1.600000e+01 : f32
      %26 = vector.broadcast %cst_15 : f32 to vector<16x128xf32>
      %27 = arith.select %25, %23, %26 : vector<16x128xi1>, vector<16x128xf32>
      %cst_16 = arith.constant dense<0x7F800000> : vector<128xf32>
      %28 = vector.multi_reduction <minimumf>, %27, %cst_16 [0] : vector<16x128xf32> to vector<128xf32>
      %29 = vector.shape_cast %28 : vector<128xf32> to vector<1x128xf32>
      %30 = vector.broadcast %29 : vector<1x128xf32> to vector<16x128xf32>
      %31 = arith.cmpf oeq, %23, %30 : vector<16x128xf32>
      %32 = arith.extui %31 : vector<16x128xi1> to vector<16x128xi32>
      %33 = arith.sitofp %32 : vector<16x128xi32> to vector<16x128xf32>
      %c0_17 = arith.constant 0 : index
      %c0_18 = arith.constant 0 : index
      %34 = vector.load %arg5[%c0_17, %c0_18] : memref<4x16xf32, #tpu.memory_space<vmem>>, vector<4x16xf32>
      %cst_19 = arith.constant dense<0.000000e+00> : vector<4x128xf32>
      %35 = tpu.matmul %34, %33, %cst_19 {dimension_numbers = #tpu.dot_dimension_numbers<[1], [0], [0], [1], [0, 0, 1, 1], [], []>} : vector<4x16xf32>, vector<16x128xf32>, vector<4x128xf32> -> vector<4x128xf32>
      %36 = arith.fptosi %29 : vector<1x128xf32> to vector<1x128xi32>
      %c0_20 = arith.constant 0 : index
      %37 = arith.index_cast %7 : i32 to index
      %38 = vector.load %arg7[%c0_20, %37] : memref<1x384xi32, #tpu.memory_space<vmem>>, vector<1x128xi32>
      tpu.vector_store %arg7[%c0_20, %37], %36 {strides = array<i32>} : memref<1x384xi32, #tpu.memory_space<vmem>>, vector<1x128xi32>,
      %39 = tpu.iota {dimensions = array<i32: 1>} : vector<1x128xi32>
      %c384_i32 = arith.constant 384 : i32
      %40 = arith.muli %arg0, %c384_i32 : i32
      %41 = arith.addi %40, %7 : i32
      %42 = vector.broadcast %41 : i32 to vector<1x128xi32>
      %43 = arith.addi %39, %42 : vector<1x128xi32>
      %c512_i32 = arith.constant 512 : i32
      %44 = vector.broadcast %c512_i32 : i32 to vector<1x128xi32>
      %45 = arith.cmpi slt, %43, %44 : vector<1x128xi32>
      %46 = arith.extui %45 : vector<1x128xi1> to vector<1x128xi32>
      %47 = arith.sitofp %46 : vector<1x128xi32> to vector<1x128xf32>
      %48 = arith.mulf %12, %12 : vector<8x128xf32>
      %cst_21 = arith.constant dense<0.000000e+00> : vector<128xf32>
      %49 = vector.multi_reduction <add>, %48, %cst_21 [0] : vector<8x128xf32> to vector<128xf32>
      %50 = vector.shape_cast %49 : vector<128xf32> to vector<1x128xf32>
      %51 = arith.addf %21, %50 : vector<1x128xf32>
      %cst_22 = arith.constant 0.000000e+00 : f32
      %52 = vector.broadcast %cst_22 : f32 to vector<1x128xf32>
      %53 = arith.maximumf %51, %52 : vector<1x128xf32>
      %54 = arith.subf %35, %10 : vector<4x128xf32>
      %55 = arith.mulf %54, %54 : vector<4x128xf32>
      %cst_23 = arith.constant dense<0.000000e+00> : vector<128xf32>
      %56 = vector.multi_reduction <add>, %55, %cst_23 [0] : vector<4x128xf32> to vector<128xf32>
      %57 = vector.shape_cast %56 : vector<128xf32> to vector<1x128xf32>
      %58 = arith.mulf %47, %57 : vector<1x128xf32>
      %cst_24 = arith.constant dense<0.000000e+00> : vector<1xf32>
      %59 = vector.multi_reduction <add>, %58, %cst_24 [1] : vector<1x128xf32> to vector<1xf32>
      %60 = vector.shape_cast %59 : vector<1xf32> to vector<1x1xf32>
      %61 = arith.mulf %47, %53 : vector<1x128xf32>
      %cst_25 = arith.constant dense<0.000000e+00> : vector<1xf32>
      %62 = vector.multi_reduction <add>, %61, %cst_25 [1] : vector<1x128xf32> to vector<1xf32>
      %63 = vector.shape_cast %62 : vector<1xf32> to vector<1x1xf32>
      %c0_26 = arith.constant 0 : index
      %c0_27 = arith.constant 0 : index
      %64 = vector.load %arg6[%c0_26, %c0_27] : memref<8x128xf32, #tpu.memory_space<vmem>>, vector<8x128xf32>
      %c0_i32_28 = arith.constant 0 : i32
      %65 = vector.broadcast %c0_i32_28 : i32 to vector<8x128xi32>
      %66 = arith.cmpi eq, %0, %65 : vector<8x128xi32>
      %cst_29 = arith.constant 0.000000e+00 : f32
      %67 = vector.shape_cast %60 : vector<1x1xf32> to vector<1x1xf32>
      %68 = vector.broadcast %67 : vector<1x1xf32> to vector<8x128xf32>
      %69 = vector.broadcast %cst_29 : f32 to vector<8x128xf32>
      %70 = arith.select %66, %68, %69 : vector<8x128xi1>, vector<8x128xf32>
      %c1_i32_30 = arith.constant 1 : i32
      %71 = vector.broadcast %c1_i32_30 : i32 to vector<8x128xi32>
      %72 = arith.cmpi eq, %0, %71 : vector<8x128xi32>
      %cst_31 = arith.constant 0.000000e+00 : f32
      %73 = vector.shape_cast %63 : vector<1x1xf32> to vector<1x1xf32>
      %74 = vector.broadcast %73 : vector<1x1xf32> to vector<8x128xf32>
      %75 = vector.broadcast %cst_31 : f32 to vector<8x128xf32>
      %76 = arith.select %72, %74, %75 : vector<8x128xi1>, vector<8x128xf32>
      %77 = arith.addf %70, %76 : vector<8x128xf32>
      %78 = arith.addf %64, %77 : vector<8x128xf32>
      %c0_32 = arith.constant 0 : index
      %c0_33 = arith.constant 0 : index
      %79 = vector.load %arg6[%c0_32, %c0_33] : memref<8x128xf32, #tpu.memory_space<vmem>>, vector<8x128xf32>
      tpu.vector_store %arg6[%c0_32, %c0_33], %78 {strides = array<i32>} : memref<8x128xf32, #tpu.memory_space<vmem>>, vector<8x128xf32>,
    }
    %c3_i32_1 = arith.constant 3 : i32
    return
  }
  func.func @transform_0(%arg0: i32) -> (i32, i32) {
    %c0_i32 = arith.constant 0 : i32
    %c0_i32_0 = arith.constant 0 : i32
    return %c0_i32, %arg0 : i32, i32
  }
  func.func @transform_1(%arg0: i32) -> (i32, i32) {
    %c0_i32 = arith.constant 0 : i32
    %c0_i32_0 = arith.constant 0 : i32
    %c0_i32_1 = arith.constant 0 : i32
    return %c0_i32, %c0_i32_0 : i32, i32
  }
  func.func @transform_2(%arg0: i32) -> (i32, i32) {
    %c0_i32 = arith.constant 0 : i32
    %c0_i32_0 = arith.constant 0 : i32
    %c0_i32_1 = arith.constant 0 : i32
    return %c0_i32, %c0_i32_0 : i32, i32
  }
  func.func @transform_3(%arg0: i32) -> (i32, i32) {
    %c0_i32 = arith.constant 0 : i32
    %c0_i32_0 = arith.constant 0 : i32
    %c0_i32_1 = arith.constant 0 : i32
    return %c0_i32, %c0_i32_0 : i32, i32
  }
  func.func @transform_4(%arg0: i32) -> (i32, i32) {
    %c0_i32 = arith.constant 0 : i32
    %c0_i32_0 = arith.constant 0 : i32
    %c0_i32_1 = arith.constant 0 : i32
    return %c0_i32, %c0_i32_0 : i32, i32
  }
  func.func @transform_5(%arg0: i32) -> (i32, i32) {
    %c0_i32 = arith.constant 0 : i32
    %c0_i32_0 = arith.constant 0 : i32
    return %arg0, %c0_i32 : i32, i32
  }
  func.func @transform_6(%arg0: i32) -> (i32, i32) {
    %c0_i32 = arith.constant 0 : i32
    %c0_i32_0 = arith.constant 0 : i32
    return %c0_i32, %arg0 : i32, i32
  }
}

</mosaic_0001>

<bundles_post_ra>
// kernel: tpu_custom_call.1
= control target key start
LH: loop header
LB: loop body
LE: loop exit
PB: predicated region body
PF: predicated region fallthrough
CT: control target
= control target key end

     0   :  { %12 = vsyncpa [#allocation3], 0  ;;  %s1193_s0 = inlined_call_operand.vmem [shape: bf16[4,768], index: 0, kind: input, shape index: {}]   ;;  %s1194_s1 = inlined_call_operand.vmem [shape: f32[8,4], index: 1, kind: input, shape index: {}]   ;;  %s1195_s2 = inlined_call_operand.vmem [shape: f32[16,8], index: 2, kind: input, shape index: {}]   ;;  %s1196_s3 = inlined_call_operand.vmem [shape: f32[16,1], index: 3, kind: input, shape index: {}]   ;;  %s1197_s4 = inlined_call_operand.vmem [shape: f32[4,16], index: 4, kind: input, shape index: {}]   ;;  %s1198_s5 = inlined_call_operand.hbm [shape: f32[16,128], index: 5, kind: output, shape index: {0}]   ;;  %s1199_s6 = inlined_call_operand.hbm [shape: s32[1,768], index: 6, kind: output, shape index: {1}]  }
   0x1   :  { %14 = vsyncpa [#allocation3 + $0x1], 0 }
   0x2   :  { %15 = vsyncpa [#allocation5], 0 }
   0x3   :  { %17 = vsyncpa [#allocation5 + $0x1], 0  ;;  %s1002_s21 = smov 0   ;;  %s1004_s22 = smov 0  }
   0x4   :  { %s1006_s23 = smov 0   ;;  %s1008_s24 = smov 0  }
   0x5 LB: > { %s1023_s25 = sadd.s32 4294967295, %s953_s24   ;;  %s741_s26 = sadd.s32 4294967294, %s953_s24   ;;  %s953_s24 = sphi %s1008_s24, %s1205_s24   ;;  %s949_s23 = sphi %s1006_s23, %s1204_s23   ;;  %s945_s22 = sphi %s1004_s22, %s1203_s22   ;;  %s941_s21 = sphi %s1002_s21, %s1202_s21  }
   0x6   : > { %s1027_s27 = sadd.s32 1, %s953_s24   ;;  %s140_s28 = sadd.s32 1, %s949_s23 }
   0x7   : > { %s137_s29 = ssub.s32 %s953_s24, %s1027_s27  ;;  %p150_p0 = scmp.ne.s32.totalorder %s949_s23, %s945_s22 }
   0x8   : > { %p138_p1 = scmp.eq.s32.totalorder %s137_s29, 0  ;;  %p151_p2 = scmp.eq.s32.totalorder %s1023_s25, 1 }
   0x9   : > { %p156_p3 = scmp.ne.s32.totalorder %s945_s22, %s941_s21  ;;  %p157_p4 = scmp.eq.s32.totalorder %s741_s26, 1 }
   0xa   : > { %s1038_s30 = scalar_select %p138_p1, %s949_s23, %s140_s28  }
   0xb   : > { %p1040_p5 = por %p151_p2, %p150_p0  ;;  %p1044_p6 = por %p157_p4, %p156_p3 }
   0xc   : > { %p744_p7 = scmp.ge.s32.totalorder %s953_s24, 1  ;;  %p222_p8 = scmp.lt.s32.totalorder %s953_s24, 3 }
   0xe   : > { %p223_p9 = pnand %p744_p7, %p222_p8 }
   0xf   : > { %s1051_s9 = sand.u32 (!%p223_p9), 1, %s945_s22   ;;  %s257_s10 = smul.u32 (!%p223_p9), 3, %s1023_s25  ;;  %v264_v0 = vlaneseq (!%p223_p9)  ;;  %v959_v2 = vmov (!%p223_p9), 0.0  }
  0x10   : > { %226 = sbr.rel (%p223_p9) target bundleno = 921 (0x399), region = 40  ;;  %s745_s11 = sshll.u32 (!%p223_p9), %s1051_s9, 3 }
  0x11   : > { %s793_s12 = smul.u32 (!%p223_p9), 3, %s1051_s9  ;;  %p258_p10 = scmp.lt.s32.totalorder (!%p223_p9), %s257_s10, 5  ;;  %v1057_v1 = vand.u32 (!%p223_p9), 127, %v264_v0 }
  0x12   : > { %s1059_s13 = scalar_lea.vmem (!%p223_p9), [#allocation2], %s745_s11  ;;  %s1069_s19 = smov (!%p223_p9), 0  }
  0x13   : > { %266 = vst [vmem:[%s1059_s13] sm:$0xff] (!%p223_p9), %v959_v2  ;;  %s1067_s18 = scalar_lea.vmem (!%p223_p9), [#allocation4], %s793_s12 }
  0x17   : > { %s1207_s10 = smov (!%p258_p10, %s257_s10), 5 }
  0x18   : > { %s746_s14 = sshll.u32 %s1207_s10, 1 }
  0x19   : > { %s1065_s17 = scalar_lea.vmem %s1193_s0, %s746_s14 }
  0x1a LB: >> { %v960_v3 = vmov 0.0   ;;  %vm961_vm0 = vmmov 0   ;;  %s747_s20 = sshll.u32 %s957_s19, 7  ;;  %vm285_vm1 = vcmask 1043456   ;;  %v280_v6 = vld [vmem:[%s1194_s1] sm:$0xff]  ;;  %vm281_vm2 = vcmask 31744   ;;  %s957_s19 = sphi %s1069_s19, %s272_s19  }
  0x1b   : >> { %773 = vmatprep.subr.mxu0 %v960_v3  ;;  %775 = vmatprep.mubr.msk.f32.mxu0 %vm961_vm0, %v960_v3  ;;  %s1079_s26 = sshra.s32 %s747_s20, 7  ;;  %v359_v7 = vld [vmem:[%s1195_s2] sm:$0xff]  ;;  %vm361_vm3 = vcmask 64512   ;;  %v962_v9 = vmov 0   ;;  %v444_v10 = vld [vmem:[%s1196_s3 + $0x8] sm:$0xff]  ;;  %v963_v14 = vmov 0.0|0.0  }
  0x1c   : >> { %s748_s28 = sshll.u32 %s1079_s26, 1  ;;  %780 = vmatprep.mubr.msk.f32.mxu1 %vm361_vm3, %v359_v7  ;;  %v443_v8 = vld [vmem:[%s1196_s3] sm:$0xff]  ;;  %854 = vset.pattern.permute.xlu0 %v962_v9  ;;  %v360_v12 = vld [vmem:[%s1195_s2 + $0x8] sm:$0xff]  ;;  %v467_v29 = vshrl.u32 %v264_v0, 7  ;;  %s564_s12 = scalar_lea.vmem %s1067_s18, %s1079_s26 [#allocation4]  ;;  %vm567_vm9 = vcmp.lt.s32.totalorder %v264_v0, 128  ;;  %vm489_vm10 = vcmask 130048  }
  0x1d   : >> { %s277_s29 = scalar_lea.vmem %s1065_s17, %s748_s28  ;;  %449 = vperm.xlu0 %854, %v443_v8   ;;  %v964_v52 = vmov 1.0|1.0   ;;  %v488_v54 = vld [vmem:[%s1197_s4] sm:$0xf]  ;;  %s570_s16 = smul.u32 384, %s1023_s25  ;;  %vm602_vm12 = vcmp.eq.s32.totalorder %v1057_v1, 0 }
  0x1e   : >> { %v1083_v4 = vld [vmem:[%s277_s29] sm:$0x3]  ;;  %v468_v33 = vadd.s32 8, %v467_v29  ;;  %v469_v37 = vcvt.s32.f32 %v467_v29  ;;  %vm604_vm13 = vcmp.eq.s32.totalorder %v1057_v1, 1  ;;  %s272_s19 = sadd.s32 1, %s957_s19  }
  0x1f   : >> { %v279_v5 = vunpack.c.l.bf16 %v1083_v4  ;;  %s571_s26 = sadd.s32 %s747_s20, %s570_s16  ;;  %p269_p11 = scmp.ge.s32.totalorder %s272_s19, 3  }
  0x20   : >> { %v470_v38 = vcvt.s32.f32 %v468_v33  ;;  %v572_v61 = vstv %s571_s26  ;;  %s760_s20 = sshll.u32 (%p269_p11), %s1023_s25, 7  ;;  %s628_s11 = sshll.u32 (%p269_p11), %s1059_s13, 4  ;;  %s629_s11 = int_to_ptr.vmem [resolvable:$true] %s628_s11 }
  0x21   : >> { %774 = vmatpush3.msk.msra.mxu0 %vm285_vm1, %v279_v5  ;;  %454 = vperm.xlu0 %854, %v444_v10   ;;  %v573_v63 = vadd.s32 %v572_v61, %v1057_v1  ;;  %s1131_s10 = scalar_lea.hbm (%p269_p11), %s1198_s5, %s760_s20  ;;  %s855_s14 = scalar_lea.vmem (%p269_p11), %s629_s11, 128 }
  0x22   : >> { %776 = vmatmul.mubr.msk.f32.vlgmr.msra.gmra.mrb[0].mxu0 %vm281_vm2, %v280_v6  ;;  %790 = vmatprep.subr.bf16.mxu0 %v963_v14  ;;  %v601_v14 = vld [vmem:[%s1059_s13] sm:$0xff]  ;;  %p856_p12 = scmp.ne.s32.totalorder (%p269_p11), %s629_s11, %s855_s14  ;;  %s965_s19 = smov (%p269_p11), [#allocation2]  }
  0x23   : >> { %787 = vmatprep.mubr.msk.f32.mxu0 %vm961_vm0, %v960_v3  ;;  %vm574_vm11 = vcmp.lt.s32.totalorder %v573_v63, 512  ;;  %s859_s15 = sshll.u32 (%p269_p11), %s965_s19, 4  ;;  %s860_s15 = int_to_ptr.vmem [resolvable:$false] %s859_s15 }
  0x24   : >> { %v758_v4 = vsel %vm574_vm11, 1.0, %v960_v3  ;;  %p857_p13 = pnand (%p269_p11), %p856_p12, %p1040_p5  ;;  %s861_s17 = scalar_lea.vmem (%p269_p11), %s860_s15, 256 }
  0x25   : > { %p862_p1 = scmp.lt.s32.totalorder (%p269_p11), %s629_s11, %s860_s15  ;;  %p863_p2 = scmp.lt.s32.totalorder (%p269_p11), %s861_s17, %s855_s14 }
  0x26   : > { %p858_p0 = pneg (%p269_p11), %p857_p13 }
  0x27   : > { %p864_p3 = por (%p269_p11), %p863_p2, %p862_p1 }
  0x29   : > { %p865_p4 = pnand (%p269_p11), %p864_p3, %p858_p0 }
  0x9c   : >> { %v450_v16 = vpop.permute.xlu0 %449 }
  0xa0   : >> { %v455_v22 = vpop.permute.xlu0 %454 }
  0xf5   : >> { %v355_v11 = vpop.f32.mrb[0].mxu0 }
  0xf6   : >> { %v777_v13 = vpop.f32.mrb[1].mxu0  ;;  %778 = vmatprep.subr.mxu1 %v355_v11  ;;  %v577_v15 = vmul.f32 %v355_v11, %v355_v11 }
  0xf7   : >> { %779 = vmatpush3.msra.mxu1 %v355_v11 }
  0xf8   : >> { %781 = vmatmul.mubr.msk.f32.vlgmr.msra.gmra.mrb[0].mxu1 %vm361_vm3, %v360_v12  ;;  %v578_v17 = vrot.slane %v577_v15, 4 }
  0xfa   : >> { %v579_v21 = vadd.f32 %v578_v17, %v577_v15 }
  0xfc   : >> { %v580_v26 = vrot.slane %v579_v21, 2 }
  0xfe   : >> { %v581_v30 = vadd.f32 %v580_v26, %v579_v21 }
 0x100   : >> { %v582_v35 = vrot.slane %v581_v30, 1 }
 0x102   : >> { %v583_v40 = vadd.f32 %v582_v35, %v581_v30 }
 0x1cb   : >> { %v782_v18 = vpop.f32.mrb[0].mxu1 }
 0x1cc   : >> { %v446_v19 = vmul.f32 2.0, %v782_v18  ;;  %v434_v20 = vpop.f32.mrb[1].mxu1 }
 0x1cd   : >> { %v445_v23 = vmul.f32 2.0, %v434_v20 }
 0x1ce   : >> { %v458_v24 = vsub.f32 %v455_v22, %v446_v19 }
 0x1cf   : >> { %v457_v25 = vsub.f32 %v450_v16, %v445_v23 }
 0x1d1   : >> { %v459_v27 = vmin.f32 %v457_v25, %v458_v24 }
 0x1d3   : >> { %v460_v28 = vrot.slane %v459_v27, 4 }
 0x1d5   : >> { %v461_v31 = vmin.f32 %v459_v27, %v460_v28 }
 0x1d7   : >> { %v462_v32 = vrot.slane %v461_v31, 2 }
 0x1d9   : >> { %v463_v34 = vmin.f32 %v461_v31, %v462_v32 }
 0x1db   : >> { %v464_v36 = vrot.slane %v463_v34, 1 }
 0x1dd   : >> { %v465_v39 = vmin.f32 %v463_v34, %v464_v36 }
 0x1df   : >> { %vm471_vm4 = vcmp.le.f32.partialorder %v457_v25, %v465_v39  ;;  %vm472_vm5 = vcmp.le.f32.partialorder %v458_v24, %v465_v39  ;;  %v584_v41 = vadd.f32 %v583_v40, %v465_v39 }
 0x1e0   : >> { %v473_v42 = vsel %vm471_vm4, %v469_v37, 16.0  ;;  %v474_v43 = vsel %vm472_vm5, %v470_v38, 16.0 }
 0x1e1   : >> { %v475_v44 = vmin.f32 %v473_v42, %v474_v43  ;;  %v585_v9 = vmax.f32 %v584_v41, 0.0 }
 0x1e3   : >> { %v476_v45 = vrot.slane %v475_v44, 4  ;;  %v598_v10 = vmul.f32 %v758_v4, %v585_v9 }
 0x1e5   : >> { %v477_v46 = vmin.f32 %v475_v44, %v476_v45 }
 0x1e7   : >> { %v478_v47 = vrot.slane %v477_v46, 2 }
 0x1e9   : >> { %v479_v48 = vmin.f32 %v477_v46, %v478_v47 }
 0x1eb   : >> { %v480_v49 = vrot.slane %v479_v48, 1 }
 0x1ed   : >> { %v481_v50 = vmin.f32 %v479_v48, %v480_v49 }
 0x1ef   : >> { %vm482_vm6 = vcmp.eq.f32.partialorder %v469_v37, %v481_v50  ;;  %vm483_vm7 = vcmp.eq.f32.partialorder %v470_v38, %v481_v50  ;;  %v794_v51 = vtrunc.f32 %v481_v50 }
 0x1f0   : >> { %vm791_vm8 = vmpackc.low %vm483_vm7, %vm482_vm6 }
 0x1f1   : >> { %792 = vmatpush3.bf16.msk.msra.mxu0 %vm791_vm8, %v964_v52  ;;  %v795_v53 = vcvt.f32.s32 %v794_v51 }
 0x1f3   : >> { %569 = vst.msk [vmem:[%s564_s12] sm:$0x1] %vm567_vm9, %v795_v53  ;;  %s610_s12 = scalar_lea.sflag (%p269_p11), [#allocation3], %s1051_s9 }
 0x1f4   : >> { %788 = vmatmul.mubr.msk.f32.vlgmr.msra.gmra.mrb[2].mxu0 %vm489_vm10, %v488_v54 }
 0x2c7   : >> { %v559_v55 = vpop.f32.mrb[2].mxu0 }
 0x2c8   : >> { %v586_v56 = vsub.f32 %v559_v55, %v279_v5  ;;  %v789_v57 = vpop.f32.mrb[3].mxu0 }
 0x2ca   : >> { %v587_v58 = vmul.f32 %v586_v56, %v586_v56 }
 0x2cc   : >> { %v588_v59 = vsel %vm285_vm1, %v587_v58, 0.0 }
 0x2cd   : >> { %v589_v60 = vrot.slane %v588_v59, 4 }
 0x2cf   : >> { %v590_v62 = vadd.f32 %v589_v60, %v588_v59 }
 0x2d1   : >> { %v591_v2 = vrot.slane %v590_v62, 2 }
 0x2d3   : >> { %v592_v6 = vadd.f32 %v591_v2, %v590_v62 }
 0x2d5   : >> { %v593_v7 = vrot.slane %v592_v6, 1 }
 0x2d7   : >> { %v594_v8 = vadd.f32 %v593_v7, %v592_v6 }
 0x2d9   : >> { %v595_v5 = vmul.f32 %v758_v4, %v594_v8 }
 0x2db   : >> { %596 = vadd.xlane.f32.xlu1 %v595_v5 }
 0x2df   : >> { %599 = vadd.xlane.f32.xlu1 %v598_v10 }
 0x368   : >> { %v597_v11 = vpop.xlane.xlu1 %596 }
 0x369   : >> { %v603_v13 = vsel %vm602_vm12, %v597_v11, 0.0 }
 0x36c   : >> { %v600_v12 = vpop.xlane.xlu1 %599  ;;  %271 = sbr.rel (!%p269_p11) target bundleno = 26 (0x1a), region = 101 }
 0x36d   : >> { %v605_v15 = vsel %vm604_vm13, %v600_v12, 0.0 }
 0x36e   : >> { %v606_v16 = vadd.f32 %v605_v15, %v603_v13 }
 0x370   : >> { %v607_v17 = vadd.f32 %v606_v16, %v601_v14 }
 0x372   : >> { %608 = vst [vmem:[%s1059_s13] sm:$0xff] %v607_v17 }
 0x373   : > { %868 = shalt.err (!%p865_p4)
}
 0x374   : > { %s869_s13 = scalar_lea.hbm %s1131_s10, 128  ;;  %s873_s20 = scalar_lea.hbm %s1198_s5, 256 }
 0x375   : > { %p870_p7 = scmp.ne.s32.totalorder %s1131_s10, %s869_s13  ;;  %p874_p10 = scmp.lt.u32.totalorder %s1131_s10, %s1198_s5 }
 0x376   : > { %p875_p11 = scmp.lt.u32.totalorder %s873_s20, %s869_s13  ;;  %p877_p13 = scmp.lt.u32.totalorder %s869_s13, %s1131_s10 }
 0x377   : > { %p871_p8 = pnand %p870_p7, %p1040_p5 }
 0x378   : > { %p876_p12 = por %p875_p11, %p874_p10 }
 0x379   : > { %p872_p9 = pneg %p871_p8 }
 0x37a   : > { %p878_p0 = por %p877_p13, %p876_p12 }
 0x37c   : > { %p879_p1 = pnand %p878_p0, %p872_p9 }
 0x37e   : > { %882 = shalt.err (!%p879_p1)
}
 0x37f   : > { %796 = dma.vmem_to_hbm [thread:$0]  (%p1040_p5), %s629_s11, 128, %s1131_s10, %s610_s12  }
 0x380   : > { %s764_s14 = smul.u32 48, %s1023_s25  ;;  %s642_s19 = sshll.u32 %s1067_s18, 4  ;;  %s1154_s19 = int_to_ptr.vmem [resolvable:$true] %s642_s19 }
 0x381   : > { %s615_s16 = scalar_lea.sflag [#allocation5], %s1051_s9  ;;  %s883_s26 = scalar_lea.vmem %s1154_s19, 48 }
 0x382   : > { %s640_s13 = scalar_lea.hbm %s1199_s6, %s764_s14  ;;  %p884_p2 = scmp.ne.s32.totalorder %s1154_s19, %s883_s26 }
 0x383   : > { %s966_s20 = smov [#allocation4]  }
 0x384   : > { %p885_p3 = pnand %p884_p2, %p1040_p5  ;;  %s887_s28 = sshll.u32 %s966_s20, 4  ;;  %s888_s28 = int_to_ptr.vmem [resolvable:$false] %s887_s28 }
 0x385   : > { %s889_s25 = scalar_lea.vmem %s888_s28, 96  ;;  %p890_p7 = scmp.lt.s32.totalorder %s1154_s19, %s888_s28 }
 0x386   : > { %p886_p4 = pneg %p885_p3  ;;  %p891_p8 = scmp.lt.s32.totalorder %s889_s25, %s883_s26 }
 0x388   : > { %p892_p9 = por %p891_p8, %p890_p7 }
 0x38a   : > { %p893_p10 = pnand %p892_p9, %p886_p4 }
 0x38c   : > { %896 = shalt.err (!%p893_p10)
}
 0x38d   : > { %s897_s18 = scalar_lea.hbm %s640_s13, 48  ;;  %s901_s11 = scalar_lea.hbm %s1199_s6, 96 }
 0x38e   : > { %p898_p11 = scmp.ne.s32.totalorder %s640_s13, %s897_s18  ;;  %p902_p0 = scmp.lt.u32.totalorder %s640_s13, %s1199_s6 }
 0x38f   : > { %p903_p1 = scmp.lt.u32.totalorder %s901_s11, %s897_s18  ;;  %p905_p3 = scmp.lt.u32.totalorder %s897_s18, %s640_s13 }
 0x390   : > { %p899_p12 = pnand %p898_p11, %p1040_p5 }
 0x391   : > { %p904_p2 = por %p903_p1, %p902_p0 }
 0x392   : > { %p900_p13 = pneg %p899_p12 }
 0x393   : > { %p906_p7 = por %p905_p3, %p904_p2 }
 0x395   : > { %p907_p4 = pnand %p906_p7, %p900_p13 }
 0x397   : > { %910 = shalt.err (!%p907_p4)
}
 0x398   : > { %797 = dma.vmem_to_hbm [thread:$0]  (%p1040_p5), %s1154_s19, 48, %s640_s13, %s615_s16  }
 0x399 PF: > { %p807_p8 = scmp.ge.s32.totalorder %s953_s24, 2  ;;  %s654_s14 = sand.u32 1, %s941_s21  }
 0x39a   : > { %s655_s15 = scalar_lea.sflag [#allocation3], %s654_s14 }
 0x39b   : > { %p801_p9 = pnand %p807_p8, %p1044_p6 }
 0x39d   : > { %932 = dma.done.wait (!%p801_p9), %s655_s15, 128  }
 0x39e   : > { %934 = vsyncadd (!%p801_p9), %s655_s15, 4294967168  ;;  %s664_s17 = scalar_lea.sflag [#allocation5], %s654_s14 }
 0x39f   : > { %936 = dma.done.wait (!%p801_p9), %s664_s17, 48  }
 0x3a0   : > { %938 = vsyncadd (!%p801_p9), %s664_s17, 4294967248  ;;  %p20_p5 = scmp.ge.s32.totalorder %s1027_s27, 4   ;;  %s1202_s21 = smov %s945_s22 }
 0x3a1   : > { %s1203_s22 = smov %s949_s23  ;;  %s1204_s23 = smov %s1038_s30 }
 0x3a2   : > { %s1205_s24 = smov %s1027_s27  ;;  %22 = sbr.rel (!%p20_p5) target bundleno = 5 (0x5), region = 112 }
 0x3a9   :  { %669 = vsyncpa [#allocation3], 1 }
 0x3aa   :  { %671 = vsyncpa [#allocation3 + $0x1], 1 }
 0x3ab   :  { %672 = vsyncpa [#allocation5], 1 }
 0x3ac   :  { %674 = vsyncpa [#allocation5 + $0x1], 1 }

</bundles_post_ra>
